<compile_context>
chip_gen: v5e
topology: v5e:2x2
jax: 0.10.0
libtpu: 0.0.40
codegen_flags: <defaults>
</compile_context>

<pallas_src>
import jax
import jax.numpy as jnp
from jax.experimental import pallas as pl
from jax.experimental.pallas import tpu as pltpu


def _ffn_kernel(x_ref, w1_ref, b1_ref, w2_ref, b2_ref, o_ref, acc_ref):
    """Grid = (row_blocks, hidden_blocks); hidden is the reduction axis.

    x_ref  : (bm, dim)     VMEM  (caller dtype; cast to matmul dtype here)
    w1_ref : (dim, bh)     VMEM  (Linear1.weight.T column slab, compute dtype)
    b1_ref : (1, bh)       VMEM  (Linear1.bias slab, f32)
    w2_ref : (bh, dim)     VMEM  (Linear2.weight.T row slab, compute dtype)
    b2_ref : (1, dim)      VMEM  (Linear2.bias, f32)
    o_ref  : (bm, dim)     VMEM  (written only on the last hidden step)
    acc_ref: (bm, dim) f32 VMEM scratch accumulator
    """
    k = pl.program_id(1)

    @pl.when(k == 0)
    def _():
        acc_ref[...] = jnp.zeros_like(acc_ref)

    # Cast x on the VPU (free filler under the MXU); DMA stays in caller dtype.
    x = x_ref[...].astype(w1_ref.dtype)

    # First Linear, hidden slab k: (bm, dim) @ (dim, bh) -> f32, + bias slab.
    h = jnp.dot(x, w1_ref[...], preferred_element_type=jnp.float32)
    h = h + b1_ref[...]

    # nn.Identity() -- no activation.

    # Second Linear partial sum: (bm, bh) @ (bh, dim) accumulated in f32.
    h = h.astype(w2_ref.dtype)
    acc_ref[...] += jnp.dot(h, w2_ref[...], preferred_element_type=jnp.float32)

    @pl.when(k == pl.num_programs(1) - 1)
    def _():
        o_ref[...] = (acc_ref[...] + b2_ref[...]).astype(o_ref.dtype)


def _round_up(v, mult):
    return ((v + mult - 1) // mult) * mult


def _pick_block_h(hidden, block_h):
    """Largest multiple of 128 <= block_h that exactly divides hidden.

    Exact division is required for correctness: OOB reads of a padded weight
    slab would feed garbage into the accumulator.  Falls back to the full
    hidden dimension (un-tiled) if no such divisor exists.
    """
    if hidden <= block_h:
        return hidden
    bh = (block_h // 128) * 128
    while bh >= 128:
        if hidden % bh == 0:
            return bh
        bh -= 128
    return hidden


def feedforward_pallas(x, w1, b1, w2, b2, *, block_m=256, block_h=512,
                       compute_dtype=jnp.bfloat16, out_dtype=None):
    """x: (..., dim); w1: (dim, hidden); b1: (hidden,); w2: (hidden, dim); b2: (dim,).

    Weights are the PyTorch nn.Linear weights stored transposed (for x @ W).
    For best performance store w1/w2 pre-cast to `compute_dtype` (bf16) so no
    per-call cast pass over HBM is needed.
    """
    orig_shape = x.shape
    out_dtype = x.dtype if out_dtype is None else out_dtype
    dim = x.shape[-1]
    hidden = w1.shape[1]

    # Flatten all leading dims (batch, seq, ...) into one row axis.
    x2 = x.reshape(-1, dim)
    m = x2.shape[0]

    # Row-block size: multiple of 8 (sublane constraint); at least 2 grid
    # steps along the parallel axis when M allows (both TensorCores on v7x).
    bm = min(_round_up(block_m, 8), _round_up(m, 8))
    if pl.cdiv(m, bm) < 2 and m > 8:
        bm = _round_up(pl.cdiv(m, 2), 8)
    bm = max(bm, 8)

    # Hidden-block size (exact divisor of hidden, lane-aligned when tiled).
    bh = _pick_block_h(hidden, block_h)

    cd = compute_dtype if compute_dtype is not None else x.dtype
    w1c = w1 if w1.dtype == cd else w1.astype(cd)
    w2c = w2 if w2.dtype == cd else w2.astype(cd)
    b1r = b1.reshape(1, hidden).astype(jnp.float32)
    b2r = b2.reshape(1, dim).astype(jnp.float32)

    grid = (pl.cdiv(m, bm), hidden // bh)

    itemsize = lambda a: jnp.dtype(a.dtype).itemsize
    cost = pl.CostEstimate(
        flops=4 * m * dim * hidden,
        transcendentals=0,
        bytes_accessed=(m * dim * itemsize(x2)
                        + dim * hidden * itemsize(w1c)
                        + hidden * dim * itemsize(w2c)
                        + hidden * 4 + dim * 4
                        + m * dim * jnp.dtype(out_dtype).itemsize),
    )

    out = pl.pallas_call(
        _ffn_kernel,
        out_shape=jax.ShapeDtypeStruct((m, dim), out_dtype),
        grid=grid,
        in_specs=[
            pl.BlockSpec((bm, dim), lambda i, k: (i, 0)),      # x row block
            pl.BlockSpec((dim, bh), lambda i, k: (0, k)),      # W1 column slab
            pl.BlockSpec((1, bh), lambda i, k: (0, k)),        # b1 slab (f32)
            pl.BlockSpec((bh, dim), lambda i, k: (k, 0)),      # W2 row slab
            pl.BlockSpec((1, dim), lambda i, k: (0, 0)),       # b2 (f32, resident)
        ],
        out_specs=pl.BlockSpec((bm, dim), lambda i, k: (i, 0)),
        scratch_shapes=[pltpu.VMEM((bm, dim), jnp.float32)],   # f32 accumulator
        compiler_params=pltpu.CompilerParams(
            dimension_semantics=("parallel", "arbitrary"),
        ),
        cost_estimate=cost,
    )(x2, w1c, b1r, w2c, b2r)

    return out.reshape(orig_shape[:-1] + (dim,)).astype(out_dtype)


def feedforward_reference(x, w1, b1, w2, b2):
    """Pure-JAX f32 reference mirroring the PyTorch forward."""
    h = x @ w1 + b1          # nn.Linear(dim, hidden)
    # nn.Identity()
    return h @ w2 + b2       # nn.Linear(hidden, dim)


def feedforward_reference_bf16ops(x, w1, b1, w2, b2):
    """Reference with the same bf16 matmul operands / f32 accumulation as the kernel."""
    h = jnp.dot(x.astype(jnp.bfloat16), w1.astype(jnp.bfloat16),
                preferred_element_type=jnp.float32) + b1
    return jnp.dot(h.astype(jnp.bfloat16), w2.astype(jnp.bfloat16),
                   preferred_element_type=jnp.float32) + b2


if __name__ == "__main__":
    # Small shapes consistent with the module: batch=2, seq=16, dim=64, hidden=128
    B, N, DIM, HIDDEN = 2, 16, 64, 128

    key = jax.random.PRNGKey(0)
    kx, k1, kb1, k2, kb2 = jax.random.split(key, 5)

    x = jax.random.normal(kx, (B, N, DIM), dtype=jnp.float32)
    # nn.Linear weights stored transposed for x @ W; pre-cast to bf16 once
    # (parameter-setup-time cast, not per call).
    w1 = (jax.random.normal(k1, (DIM, HIDDEN), dtype=jnp.float32) * 0.05)
    b1 = jax.random.normal(kb1, (HIDDEN,), dtype=jnp.float32) * 0.05
    w2 = (jax.random.normal(k2, (HIDDEN, DIM), dtype=jnp.float32) * 0.05)
    b2 = jax.random.normal(kb2, (DIM,), dtype=jnp.float32) * 0.05
    w1_bf16 = w1.astype(jnp.bfloat16)
    w2_bf16 = w2.astype(jnp.bfloat16)

    y = feedforward_pallas(x, w1_bf16, b1, w2_bf16, b2)
    y = jax.block_until_ready(y)

    # Tight check against a reference built with the same bf16 operands /
    # f32 accumulation (isolates kernel correctness from the intended cast).
    y_ref_bf16ops = feedforward_reference_bf16ops(x, w1, b1, w2, b2)
    assert jnp.allclose(y, y_ref_bf16ops, atol=1e-3, rtol=1e-3), \
        "mismatch vs bf16-operand reference"

    # Looser sanity check against the full-f32 PyTorch-module semantics.
    y_ref_f32 = feedforward_reference(x, w1, b1, w2, b2)
    assert jnp.allclose(y, y_ref_f32, atol=5e-2, rtol=5e-2), \
        "mismatch vs f32 reference"

    print("KERNEL_OK")
</pallas_src>

<mosaic_0001>
module attributes {stable_mosaic.version = 11 : i64} {
  func.func @_ffn_kernel(%arg0: i32, %arg1: i32, %arg2: memref<16x64xf32, #tpu.memory_space<vmem>>, %arg3: memref<64x128xbf16, #tpu.memory_space<vmem>>, %arg4: memref<1x128xf32, #tpu.memory_space<vmem>>, %arg5: memref<128x64xbf16, #tpu.memory_space<vmem>>, %arg6: memref<1x64xf32, #tpu.memory_space<vmem>>, %arg7: memref<16x64xf32, #tpu.memory_space<vmem>>, %arg8: memref<16x64xf32, #tpu.memory_space<vmem>>) attributes {dimension_semantics = [#tpu.dimension_semantics<parallel>, #tpu.dimension_semantics<arbitrary>], iteration_bounds = array<i64: 2, 1>, scalar_prefetch = 0 : i64, scratch_operands = 1 : i64, tpu.core_type = #tpu.core_type<tc>, window_params = [{transform_indices = @transform_0, window_bounds = array<i64: 16, 64>}, {transform_indices = @transform_1, window_bounds = array<i64: 64, 128>}, {transform_indices = @transform_2, window_bounds = array<i64: 1, 128>}, {transform_indices = @transform_3, window_bounds = array<i64: 128, 64>}, {pipeline_mode = #tpu.pipeline_mode<synchronous>, transform_indices = @transform_4, window_bounds = array<i64: 1, 64>}, {transform_indices = @transform_5, window_bounds = array<i64: 16, 64>}]} {
    %c0_i32 = arith.constant 0 : i32
    %0 = arith.cmpi eq, %arg1, %c0_i32 : i32
    %1 = arith.extui %0 : i1 to i32
    %c0_i32_0 = arith.constant 0 : i32
    %2 = arith.cmpi ne, %1, %c0_i32_0 : i32
    scf.if %2 {
      %cst_15 = arith.constant 0.000000e+00 : f32
      %19 = vector.broadcast %cst_15 : f32 to vector<16x64xf32>
      %c0_16 = arith.constant 0 : index
      %c0_17 = arith.constant 0 : index
      %20 = vector.load %arg8[%c0_16, %c0_17] : memref<16x64xf32, #tpu.memory_space<vmem>>, vector<16x64xf32>
      tpu.vector_store %arg8[%c0_16, %c0_17], %19 {strides = array<i32>} : memref<16x64xf32, #tpu.memory_space<vmem>>, vector<16x64xf32>,
    } else {
    }
    %c0 = arith.constant 0 : index
    %c0_1 = arith.constant 0 : index
    %3 = vector.load %arg2[%c0, %c0_1] : memref<16x64xf32, #tpu.memory_space<vmem>>, vector<16x64xf32>
    %4 = arith.truncf %3 : vector<16x64xf32> to vector<16x64xbf16>
    %c0_2 = arith.constant 0 : index
    %c0_3 = arith.constant 0 : index
    %5 = vector.load %arg3[%c0_2, %c0_3] : memref<64x128xbf16, #tpu.memory_space<vmem>>, vector<64x128xbf16>
    %cst = arith.constant dense<0.000000e+00> : vector<16x128xf32>
    %6 = tpu.matmul %4, %5, %cst {dimension_numbers = #tpu.dot_dimension_numbers<[1], [0], [0], [1], [0, 0, 1, 1], [], []>} : vector<16x64xbf16>, vector<64x128xbf16>, vector<16x128xf32> -> vector<16x128xf32>
    %c0_4 = arith.constant 0 : index
    %c0_5 = arith.constant 0 : index
    %7 = vector.load %arg4[%c0_4, %c0_5] : memref<1x128xf32, #tpu.memory_space<vmem>>, vector<1x128xf32>
    %8 = vector.broadcast %7 : vector<1x128xf32> to vector<16x128xf32>
    %9 = arith.addf %6, %8 : vector<16x128xf32>
    %10 = arith.truncf %9 : vector<16x128xf32> to vector<16x128xbf16>
    %c0_6 = arith.constant 0 : index
    %c0_7 = arith.constant 0 : index
    %11 = vector.load %arg8[%c0_6, %c0_7] : memref<16x64xf32, #tpu.memory_space<vmem>>, vector<16x64xf32>
    %c0_8 = arith.constant 0 : index
    %c0_9 = arith.constant 0 : index
    %12 = vector.load %arg5[%c0_8, %c0_9] : memref<128x64xbf16, #tpu.memory_space<vmem>>, vector<128x64xbf16>
    %cst_10 = arith.constant dense<0.000000e+00> : vector<16x64xf32>
    %13 = tpu.matmul %10, %12, %cst_10 {dimension_numbers = #tpu.dot_dimension_numbers<[1], [0], [0], [1], [0, 0, 1, 1], [], []>} : vector<16x128xbf16>, vector<128x64xbf16>, vector<16x64xf32> -> vector<16x64xf32>
    %14 = arith.addf %11, %13 : vector<16x64xf32>
    %c0_11 = arith.constant 0 : index
    %c0_12 = arith.constant 0 : index
    %15 = vector.load %arg8[%c0_11, %c0_12] : memref<16x64xf32, #tpu.memory_space<vmem>>, vector<16x64xf32>
    tpu.vector_store %arg8[%c0_11, %c0_12], %14 {strides = array<i32>} : memref<16x64xf32, #tpu.memory_space<vmem>>, vector<16x64xf32>,
    %c0_i32_13 = arith.constant 0 : i32
    %16 = arith.cmpi eq, %arg1, %c0_i32_13 : i32
    %17 = arith.extui %16 : i1 to i32
    %c0_i32_14 = arith.constant 0 : i32
    %18 = arith.cmpi ne, %17, %c0_i32_14 : i32
    scf.if %18 {
      %c0_15 = arith.constant 0 : index
      %c0_16 = arith.constant 0 : index
      %19 = vector.load %arg8[%c0_15, %c0_16] : memref<16x64xf32, #tpu.memory_space<vmem>>, vector<16x64xf32>
      %c0_17 = arith.constant 0 : index
      %c0_18 = arith.constant 0 : index
      %20 = vector.load %arg6[%c0_17, %c0_18] : memref<1x64xf32, #tpu.memory_space<vmem>>, vector<1x64xf32>
      %21 = vector.broadcast %20 : vector<1x64xf32> to vector<16x64xf32>
      %22 = arith.addf %19, %21 : vector<16x64xf32>
      %c0_19 = arith.constant 0 : index
      %c0_20 = arith.constant 0 : index
      %23 = vector.load %arg7[%c0_19, %c0_20] : memref<16x64xf32, #tpu.memory_space<vmem>>, vector<16x64xf32>
      tpu.vector_store %arg7[%c0_19, %c0_20], %22 {strides = array<i32>} : memref<16x64xf32, #tpu.memory_space<vmem>>, vector<16x64xf32>,
    } else {
    }
    return
  }
  func.func @transform_0(%arg0: i32, %arg1: i32) -> (i32, i32) {
    %c0_i32 = arith.constant 0 : i32
    %c0_i32_0 = arith.constant 0 : i32
    return %arg0, %c0_i32 : i32, i32
  }
  func.func @transform_1(%arg0: i32, %arg1: i32) -> (i32, i32) {
    %c0_i32 = arith.constant 0 : i32
    %c0_i32_0 = arith.constant 0 : i32
    return %c0_i32, %arg1 : i32, i32
  }
  func.func @transform_2(%arg0: i32, %arg1: i32) -> (i32, i32) {
    %c0_i32 = arith.constant 0 : i32
    %c0_i32_0 = arith.constant 0 : i32
    return %c0_i32, %arg1 : i32, i32
  }
  func.func @transform_3(%arg0: i32, %arg1: i32) -> (i32, i32) {
    %c0_i32 = arith.constant 0 : i32
    %c0_i32_0 = arith.constant 0 : i32
    return %arg1, %c0_i32 : i32, i32
  }
  func.func @transform_4(%arg0: i32, %arg1: i32) -> (i32, i32) {
    %c0_i32 = arith.constant 0 : i32
    %c0_i32_0 = arith.constant 0 : i32
    %c0_i32_1 = arith.constant 0 : i32
    return %c0_i32, %c0_i32_0 : i32, i32
  }
  func.func @transform_5(%arg0: i32, %arg1: i32) -> (i32, i32) {
    %c0_i32 = arith.constant 0 : i32
    %c0_i32_0 = arith.constant 0 : i32
    return %arg0, %c0_i32 : i32, i32
  }
}

</mosaic_0001>

<bundles_post_ra>
// kernel: tpu_custom_call.1
= control target key start
LH: loop header
LB: loop body
LE: loop exit
PB: predicated region body
PF: predicated region fallthrough
CT: control target
= control target key end

     0   :  { %10 = vsyncpa [#allocation4], 0  ;;  %s978_s0 = inlined_call_operand.vmem [shape: f32[32,64], index: 0, kind: input, shape index: {}]   ;;  %s979_s1 = inlined_call_operand.vmem [shape: bf16[64,128], index: 1, kind: input, shape index: {}]   ;;  %s980_s2 = inlined_call_operand.vmem [shape: f32[1,128], index: 2, kind: input, shape index: {}]   ;;  %s981_s3 = inlined_call_operand.vmem [shape: bf16[128,64], index: 3, kind: input, shape index: {}]   ;;  %s982_s4 = inlined_call_operand.vmem [shape: f32[1,64], index: 4, kind: input, shape index: {}]   ;;  %s983_s5 = inlined_call_operand.hbm [shape: f32[32,64], index: 5, kind: output, shape index: {}]  }
   0x1   :  { %12 = vsyncpa [#allocation4 + $0x1], 0  ;;  %s833_s18 = smov 0   ;;  %s835_s19 = smov 0  }
   0x2   :  { %s837_s20 = smov 0   ;;  %s839_s21 = smov 0  }
   0x3   :  { %s841_s22 = smov 0   ;;  %s843_s23 = smov 0  }
   0x4 LB: > { %s582_s24 = sadd.s32 4294967295, %s798_s23   ;;  %s583_s25 = sadd.s32 4294967294, %s798_s23   ;;  %s798_s23 = sphi %s843_s23, %s18_s23   ;;  %s794_s22 = sphi %s841_s22, %s990_s22   ;;  %s790_s21 = sphi %s839_s21, %s989_s21   ;;  %s786_s20 = sphi %s837_s20, %s988_s20   ;;  %s782_s19 = sphi %s835_s19, %s987_s19   ;;  %s778_s18 = sphi %s833_s18, %s986_s18  }
   0x5   : > { %s30_s26 = sadd.s32 1, %s794_s22  ;;  %s162_s27 = sadd.s32 1, %s786_s20 }
   0x6   : > { %p32_p0 = scmp.ge.s32.totalorder %s30_s26, 2  ;;  %p172_p1 = scmp.ne.s32.totalorder %s786_s20, %s782_s19 }
   0x7   : > { %p173_p2 = scmp.eq.s32.totalorder %s582_s24, 1  ;;  %p178_p3 = scmp.ne.s32.totalorder %s782_s19, %s778_s18 }
   0x8   : > { %s992_s26 = smov (%p32_p0, %s30_s26), 0  ;;  %p179_p5 = scmp.eq.s32.totalorder %s583_s25, 1 }
   0x9   : > { %p873_p4 = por %p173_p2, %p172_p1  ;;  %s159_s29 = ssub.s32 %s794_s22, %s992_s26 }
   0xa   : > { %p589_p6 = scmp.ge.s32.totalorder %s798_s23, 1  ;;  %p160_p7 = scmp.eq.s32.totalorder %s159_s29, 0 }
   0xb   : > { %p880_p8 = por %p179_p5, %p178_p3  ;;  %p231_p9 = scmp.lt.s32.totalorder %s798_s23, 3 }
   0xc   : > { %s886_s6 = scalar_select %p160_p7, %s786_s20, %s162_s27  }
   0xd   : > { %p232_p10 = pnand %p589_p6, %p231_p9 }
   0xe   : > { %s591_s9 = sshll.u32 (!%p232_p10), %s790_s21, 1  ;;  %s268_s8 = sand.u32 (!%p232_p10), 1, %s782_s19  }
   0xf   : > { %235 = sbr.rel (%p232_p10) target bundleno = 324 (0x144), region = 40  ;;  %p272_p11 = scmp.lt.s32.totalorder (!%p232_p10), %s591_s9, 3 }
  0x10   : > { %s590_s10 = sshll.u32 (!%p232_p10), %s268_s8, 4  ;;  %s659_s12 = sshll.u32 (!%p232_p10), %s790_s21, 4 }
  0x11   : > { %s466_s15 = scalar_lea.hbm (!%p232_p10), %s983_s5, %s659_s12  ;;  %s455_s21 = scalar_lea.sflag (!%p232_p10), [#allocation4], %s268_s8 }
  0x12   : > { %s469_s24 = sshll.u32 (!%p232_p10), %s466_s15, 4  ;;  %s470_s24 = int_to_ptr.hbm [resolvable:$true] %s469_s24 }
  0x13   : > { %s734_s25 = sshra.s32 (!%p232_p10), %s470_s24, 4  ;;  %s735_s25 = int_to_ptr.hbm [resolvable:$true] %s734_s25 }
  0x14   : > { %v650_v0 = vld [vmem:[%s979_s1 + $0x18] sm:$0xff]  ;;  %v649_v2 = vld [vmem:[%s979_s1 + $0x10] sm:$0xff]  ;;  %s994_s9 = smov (!%p272_p11, %s591_s9), 3  ;;  %v648_v4 = vld [vmem:[%s979_s1 + $0x8] sm:$0xff]  ;;  %vm296_vm0 = vcmask 523264   ;;  %v800_v15 = vmov 0.0   ;;  %p741_p1 = scmp.lt.s32.totalorder %s735_s25, %s983_s5 }
  0x15   : > { %v658_v1 = vld [vmem:[%s981_s3 + $0x38] sm:$0xff]  ;;  %346 = vmatpush.bf16.msra.mxu0 %v650_v0  ;;  %v657_v3 = vld [vmem:[%s981_s3 + $0x30] sm:$0xff]  ;;  %s592_s16 = sshll.u32 %s994_s9, 3  ;;  %v656_v5 = vld [vmem:[%s981_s3 + $0x28] sm:$0xff]  ;;  %297 = vst.msk [vmem:[#allocation2] sm:$0xff] %vm296_vm0, %v800_v15  ;;  %s736_s27 = scalar_lea.hbm %s735_s25, 16 }
  0x16   : > { %423 = vmatpush.bf16.msra.mxu1 %v658_v1  ;;  %s275_s29 = scalar_lea.vmem %s978_s0, %s592_s16  ;;  %v647_v6 = vld [vmem:[%s979_s1] sm:$0xff]  ;;  %v654_v11 = vld [vmem:[%s981_s3 + $0x18] sm:$0xff]  ;;  %v653_v12 = vld [vmem:[%s981_s3 + $0x10] sm:$0xff]  ;;  %298 = vst.msk [vmem:[#allocation2 + $0x8] sm:$0xff] %vm296_vm0, %v800_v15  ;;  %s270_s16 = scalar_lea.vmem [#allocation3], %s590_s10 }
  0x17   : > { %v299_v7 = vld [vmem:[%s275_s29] sm:$0xff]  ;;  %v300_v8 = vld [vmem:[%s275_s29 + $0x8] sm:$0xff]  ;;  %s467_s17 = sshll.u32 %s270_s16, 4  ;;  %p737_p12 = scmp.ne.s32.totalorder %s735_s25, %s736_s27  ;;  %s468_s17 = int_to_ptr.vmem [resolvable:$true] %s467_s17 }
  0x18   : > { %v655_v9 = vld [vmem:[%s981_s3 + $0x20] sm:$0xff]  ;;  %v301_v10 = vpack.c.bf16 %v300_v8, %v299_v7  ;;  %v652_v13 = vld [vmem:[%s981_s3 + $0x8] sm:$0xff]  ;;  %s740_s10 = scalar_lea.hbm %s983_s5, 32 }
  0x19   : > { %347 = vmatpush.bf16.msra.mxu0 %v649_v2  ;;  %v651_v14 = vld [vmem:[%s981_s3] sm:$0xff]  ;;  %p738_p13 = pnand %p737_p12, %p873_p4  ;;  %p742_p2 = scmp.lt.s32.totalorder %s740_s10, %s736_s27 }
  0x1a   : > { %424 = vmatpush.bf16.msra.mxu1 %v657_v3  ;;  %v718_v17 = vld [vmem:[%s980_s2] ss:$0 sm:$0xff] }
  0x1b   : > { %v719_v26 = vld [vmem:[%s982_s4] ss:$0 sm:$0xff]  ;;  %p739_p0 = pneg %p738_p13  ;;  %p743_p3 = por %p742_p2, %p741_p1 }
  0x1c   : > { %v357_v22 = vld [vmem:[#allocation2] sm:$0xff] }
  0x1d   : > { %348 = vmatpush.bf16.msra.mxu0 %v648_v4  ;;  %v358_v25 = vld [vmem:[#allocation2 + $0x8] sm:$0xff]  ;;  %p744_p5 = pnand %p743_p3, %p739_p0 }
  0x1e   : > { %425 = vmatpush.bf16.msra.mxu1 %v656_v5 }
  0x21   : > { %349 = vmatpush.bf16.msra.mxu0 %v647_v6 }
  0x22   : > { %426 = vmatpush.bf16.msra.mxu1 %v655_v9 }
  0x24   : > { %609 = vmatmul.msk.bf16.vlgmr.msra.gmra.mxu0 %vm296_vm0, %v301_v10 }
  0x26   : > { %427 = vmatpush.bf16.msra.mxu1 %v654_v11 }
  0x2a   : > { %428 = vmatpush.bf16.msra.mxu1 %v653_v12 }
  0x2e   : > { %429 = vmatpush.bf16.msra.mxu1 %v652_v13 }
  0x32   : > { %430 = vmatpush.bf16.msra.mxu1 %v651_v14 }
  0xa1   : > { %v351_v16 = vpop.f32.mrf.mxu0 }
  0xa2   : > { %v352_v19 = vadd.f32 %v718_v17, %v351_v16 }
  0xa9   : > { %v353_v18 = vpop.f32.mrf.mxu0 }
  0xaa   : > { %v354_v20 = vadd.f32 %v718_v17, %v353_v18 }
  0xac   : > { %v356_v21 = vpack.c.bf16 %v354_v20, %v352_v19 }
  0xae   : > { %431 = vmatmul.bf16.vlgmr.msra.gmra.mxu1 %v356_v21 }
 0x12b   : > { %v432_v23 = vpop.f32.mrf.mxu1 }
 0x12c   : > { %v437_v24 = vadd.f32 %v432_v23, %v357_v22 }
 0x12e   : > { %439 = vst.msk [vmem:[#allocation2] sm:$0xff] %vm296_vm0, %v437_v24 }
 0x133   : > { %v434_v27 = vpop.f32.mrf.mxu1 }
 0x134   : > { %v438_v28 = vadd.f32 %v434_v27, %v358_v25 }
 0x135   : > { %v444_v29 = vld [vmem:[#allocation2] sm:$0xff] }
 0x136   : > { %440 = vst.msk [vmem:[#allocation2 + $0x8] sm:$0xff] %vm296_vm0, %v438_v28  ;;  %v450_v30 = vadd.f32 %v719_v26, %v444_v29 }
 0x138   : > { %452 = vst.msk [vmem:[%s270_s16] sm:$0xff] %vm296_vm0, %v450_v30 }
 0x13d   : > { %v445_v31 = vld [vmem:[#allocation2 + $0x8] sm:$0xff] }
 0x13e   : > { %v451_v32 = vadd.f32 %v719_v26, %v445_v31 }
 0x140   : > { %453 = vst.msk [vmem:[%s270_s16 + $0x8] sm:$0xff] %vm296_vm0, %v451_v32 }
 0x141   : > { %747 = shalt.err (!%p744_p5)
}
 0x142   : > { %s801_s8 = smov 128   ;;  %s802_s12 = smov 8  }
 0x143   : > { %660 = dma.vmem_to_hbm [thread:$0]  (%p873_p4), %s468_s17, 256, %s470_s24, %s455_s21, %s801_s8, %s801_s8, %s802_s12  }
 0x144 PF: > { %p666_p6 = scmp.ge.s32.totalorder %s798_s23, 2  ;;  %s484_s13 = sand.u32 1, %s778_s18  }
 0x145   : > { %s485_s14 = scalar_lea.sflag [#allocation4], %s484_s13 }
 0x146   : > { %p663_p7 = pnand %p666_p6, %p880_p8 }
 0x148   : > { %p664_p9 = pneg %p663_p7 }
 0x14a   : > { %773 = dma.done.wait (%p664_p9), %s485_s14, 256  }
 0x14b   : > { %775 = vsyncadd (%p664_p9), %s485_s14, 4294967040  ;;  %s18_s23 = sadd.s32 1, %s798_s23   ;;  %s986_s18 = smov %s782_s19 }
 0x14c   : > { %p15_p10 = scmp.ge.s32.totalorder %s18_s23, 4   ;;  %s987_s19 = smov %s786_s20 }
 0x14d   : > { %s988_s20 = smov %s886_s6  ;;  %s989_s21 = smov %s794_s22 }
 0x14e   : > { %s990_s22 = smov %s992_s26  ;;  %17 = sbr.rel (!%p15_p10) target bundleno = 4 (0x4), region = 92 }
 0x153   :  { %491 = vsyncpa [#allocation4], 1 }
 0x154   :  { %493 = vsyncpa [#allocation4 + $0x1], 1 }

</bundles_post_ra>
